<compile_context>
chip_gen: v7x
topology: tpu7x:2x2x1
jax: 0.10.0
libtpu: 0.0.40
codegen_flags: <defaults>
</compile_context>

<pallas_src>
import jax
import jax.numpy as jnp
from jax.experimental import pallas as pl
from jax.experimental.pallas import tpu as pltpu


def _round_up(x, m):
    return ((x + m - 1) // m) * m


def _critic_kernel(sa_ref, w1p_ref, w2x_ref, w2a_ref, w3_ref, b3_ref, out_ref):
    # sa_ref : (S+A+1, TILE_B) bf16 -- rows = [state; action; ones] (streamed)
    # w1p_ref: (F1, S+A+1)     bf16 -- cols = [W1^T | 0 | b1]
    # w2x_ref: (F2, F1)        bf16 -- xs branch of fc2
    # w2a_ref: (F2, S+A+1)     bf16 -- cols = [0 | W2_action^T | b2]
    # w3_ref : (F2, 1)         f32
    # b3_ref : (1, 1)          f32
    # out_ref: (1, 1, TILE_B)  f32  -- lane-dense Q row for this tile
    sa = sa_ref[...]

    # fc1 (+b1 folded in via the ones row).
    z1 = jnp.dot(w1p_ref[...], sa, preferred_element_type=jnp.float32)
    # Fused ReLU + bf16 cast producing the fc2 operand in one pass.
    x1 = jnp.maximum(z1, 0.0).astype(jnp.bfloat16)

    # fc2 on cat(xs, action): xs branch + tiny action/bias branch (zero state
    # columns in w2a make the extra K rows free on the MXU).
    h = (jnp.dot(w2x_ref[...], x1, preferred_element_type=jnp.float32)
         + jnp.dot(w2a_ref[...], sa, preferred_element_type=jnp.float32))

    # fc3: VPU multiply + sublane reduce -> lane-dense (1, TILE_B) row.
    q = jnp.sum(jnp.maximum(h, 0.0) * w3_ref[...], axis=0, keepdims=True) + b3_ref[...]
    out_ref[0] = q.astype(out_ref.dtype)


def pack_params(params, state_size, action_size):
    """Pack [in, out]-layout params into the kernel's transposed/folded operands."""
    w1, b1, w2, b2, w3, b3 = params
    s, a = state_size, action_size
    f1 = w1.shape[1]
    f2 = w2.shape[1]
    kin = s + a + 1                                   # [state; action; ones]

    w1p = jnp.zeros((f1, kin), jnp.float32)
    w1p = w1p.at[:, :s].set(w1.T)                     # state columns
    w1p = w1p.at[:, s + a].set(b1)                    # bias via ones row

    w2x = w2[:f1].T                                   # (F2, F1)

    w2a = jnp.zeros((f2, kin), jnp.float32)
    w2a = w2a.at[:, s:s + a].set(w2[f1:].T)           # action columns
    w2a = w2a.at[:, s + a].set(b2)                    # bias via ones row

    w3c = w3.reshape(f2, 1).astype(jnp.float32)
    b3s = b3.reshape(1, 1).astype(jnp.float32)
    return (w1p.astype(jnp.bfloat16), w2x.astype(jnp.bfloat16),
            w2a.astype(jnp.bfloat16), w3c, b3s)


def critic_forward(state, action, params, *, tile_b=8192):
    """state: [B, S] f32, action: [B, A] f32 -> Q: [B, 1] f32."""
    B, s = state.shape
    a = action.shape[1]
    w1p, w2x, w2a, w3c, b3s = pack_params(params, s, a)
    f2, f1 = w2x.shape
    kin = s + a + 1

    # Batch maps to the lane axis (multiple of 128).  Large tiles amortize the
    # per-grid-step overhead; the cdiv(B, 2) clamp guarantees >=2 grid steps
    # whenever B allows so both v7x TensorCores get work.
    tile_b = _round_up(max(min(int(tile_b), 8192), 128), 128)
    tile_b = max(128, min(tile_b, _round_up(pl.cdiv(B, 2), 128)))
    b_pad = _round_up(B, tile_b)
    num_tiles = b_pad // tile_b

    # Packed input [state; action; 1]^T in bf16, zero-padded along the batch
    # (lane) axis.  concat + cast + transpose + pad fuse into one XLA producer.
    ones = jnp.ones((B, 1), state.dtype)
    sa_t = jnp.concatenate([state, action, ones], axis=1).astype(jnp.bfloat16).T
    sa_t = jnp.pad(sa_t, ((0, 0), (0, b_pad - B)))

    # Footprint-based VMEM request (+headroom), capped under v7x's 64 MiB.
    kin_pad = _round_up(kin, 16)                           # bf16 sublane packing
    in_bytes = 2 * kin_pad * tile_b * 2                    # double-buffered input tile
    out_bytes = 2 * 8 * tile_b * 4                         # double-buffered Q row
    act_bytes = (f1 + f2) * tile_b * 4 * 2 + f1 * tile_b * 2   # z1/h f32 temps + x1 bf16
    w_bytes = (f1 * kin_pad + f2 * f1 + f2 * kin_pad) * 2 * 2 + (f2 + 8) * 4 * 2
    vmem_bytes = int(min(40 << 20,
                         in_bytes + out_bytes + act_bytes + w_bytes + (8 << 20)))

    const = lambda i: (0, 0)
    out = pl.pallas_call(
        _critic_kernel,
        out_shape=jax.ShapeDtypeStruct((num_tiles, 1, tile_b), jnp.float32),
        grid=(num_tiles,),
        in_specs=[
            pl.BlockSpec((kin, tile_b), lambda i: (0, i)),   # streamed input tile
            pl.BlockSpec((f1, kin), const),                  # resident weights
            pl.BlockSpec((f2, f1), const),
            pl.BlockSpec((f2, kin), const),
            pl.BlockSpec((f2, 1), const),
            pl.BlockSpec((1, 1), const),
        ],
        out_specs=pl.BlockSpec((1, 1, tile_b), lambda i: (i, 0, 0)),
        compiler_params=pltpu.CompilerParams(
            dimension_semantics=("parallel",),
            vmem_limit_bytes=vmem_bytes,
        ),
    )(sa_t, w1p, w2x, w2a, w3c, b3s)

    return out.reshape(-1)[:B].reshape(B, 1)


def init_params(key, state_size, action_size, fcs1_units=64, fc2_units=64):
    """PyTorch nn.Linear default init U(-1/sqrt(fan_in), 1/sqrt(fan_in));
    weights stored as [in, out] (f32)."""
    ks = jax.random.split(key, 6)

    def uinit(k, shape, fan_in):
        bound = 1.0 / jnp.sqrt(jnp.float32(fan_in))
        return jax.random.uniform(k, shape, jnp.float32, -bound, bound)

    w1 = uinit(ks[0], (state_size, fcs1_units), state_size)
    b1 = uinit(ks[1], (fcs1_units,), state_size)
    fan2 = fcs1_units + action_size
    w2 = uinit(ks[2], (fan2, fc2_units), fan2)          # full fc2 weight (concat dim)
    b2 = uinit(ks[3], (fc2_units,), fan2)
    w3 = uinit(ks[4], (fc2_units, 1), fc2_units)
    b3 = uinit(ks[5], (1,), fc2_units)
    return (w1, b1, w2, b2, w3, b3)


if __name__ == "__main__":
    key = jax.random.PRNGKey(0)
    k_state, k_action, k_params = jax.random.split(key, 3)

    batch, state_size, action_size = 260, 16, 4   # small; exercises 2 grid tiles + tail pad
    state = jax.random.normal(k_state, (batch, state_size), jnp.float32)
    action = jax.random.normal(k_action, (batch, action_size), jnp.float32)
    params = init_params(k_params, state_size, action_size)

    fwd = jax.jit(critic_forward, static_argnames=("tile_b",))
    q = fwd(state, action, params)               # default tile (clamped to B/2 -> 2 tiles)
    jax.block_until_ready(q)

    # Pure-JAX reference using the same bf16 rounding points as the kernel.
    w1, b1, w2, b2, w3, b3 = params
    f1 = w1.shape[1]
    bf = lambda t: t.astype(jnp.bfloat16).astype(jnp.float32)
    xs = jnp.maximum(bf(state) @ bf(w1) + bf(b1), 0.0)
    h = jnp.maximum(bf(xs) @ bf(w2[:f1]) + bf(action) @ bf(w2[f1:]) + bf(b2), 0.0)
    q_ref = (h * w3.reshape(1, -1)).sum(axis=1, keepdims=True) + b3

    assert q.shape == (batch, 1)
    err = float(jnp.max(jnp.abs(q - q_ref)))
    assert jnp.allclose(q, q_ref, atol=2e-3, rtol=2e-3), err
    print("KERNEL_OK")
</pallas_src>

<mosaic_0001>
module attributes {stable_mosaic.version = 11 : i64} {
  func.func @_critic_kernel(%arg0: i32, %arg1: memref<21x256xbf16, #tpu.memory_space<vmem>>, %arg2: memref<64x21xbf16, #tpu.memory_space<vmem>>, %arg3: memref<64x64xbf16, #tpu.memory_space<vmem>>, %arg4: memref<64x21xbf16, #tpu.memory_space<vmem>>, %arg5: memref<64x1xf32, #tpu.memory_space<vmem>>, %arg6: memref<1x1xf32, #tpu.memory_space<vmem>>, %arg7: memref<1x1x256xf32, #tpu.memory_space<vmem>>) attributes {dimension_semantics = [#tpu.dimension_semantics<parallel>], iteration_bounds = array<i64: 2>, scalar_prefetch = 0 : i64, scratch_operands = 0 : i64, tpu.core_type = #tpu.core_type<tc>, window_params = [{transform_indices = @transform_0, window_bounds = array<i64: 21, 256>}, {pipeline_mode = #tpu.pipeline_mode<synchronous>, transform_indices = @transform_1, window_bounds = array<i64: 64, 21>}, {pipeline_mode = #tpu.pipeline_mode<synchronous>, transform_indices = @transform_2, window_bounds = array<i64: 64, 64>}, {pipeline_mode = #tpu.pipeline_mode<synchronous>, transform_indices = @transform_3, window_bounds = array<i64: 64, 21>}, {pipeline_mode = #tpu.pipeline_mode<synchronous>, transform_indices = @transform_4, window_bounds = array<i64: 64, 1>}, {pipeline_mode = #tpu.pipeline_mode<synchronous>, transform_indices = @transform_5, window_bounds = array<i64: 1, 1>}, {transform_indices = @transform_6, window_bounds = array<i64: 1, 1, 256>}]} {
    %c0 = arith.constant 0 : index
    %c0_0 = arith.constant 0 : index
    %0 = vector.load %arg1[%c0, %c0_0] : memref<21x256xbf16, #tpu.memory_space<vmem>>, vector<21x256xbf16>
    %c0_1 = arith.constant 0 : index
    %c0_2 = arith.constant 0 : index
    %1 = vector.load %arg2[%c0_1, %c0_2] : memref<64x21xbf16, #tpu.memory_space<vmem>>, vector<64x21xbf16>
    %cst = arith.constant dense<0.000000e+00> : vector<64x256xf32>
    %2 = tpu.matmul %1, %0, %cst {dimension_numbers = #tpu.dot_dimension_numbers<[1], [0], [0], [1], [0, 0, 1, 1], [], []>} : vector<64x21xbf16>, vector<21x256xbf16>, vector<64x256xf32> -> vector<64x256xf32>
    %cst_3 = arith.constant 0.000000e+00 : f32
    %3 = vector.broadcast %cst_3 : f32 to vector<64x256xf32>
    %4 = arith.maximumf %2, %3 : vector<64x256xf32>
    %5 = arith.truncf %4 : vector<64x256xf32> to vector<64x256xbf16>
    %c0_4 = arith.constant 0 : index
    %c0_5 = arith.constant 0 : index
    %6 = vector.load %arg3[%c0_4, %c0_5] : memref<64x64xbf16, #tpu.memory_space<vmem>>, vector<64x64xbf16>
    %cst_6 = arith.constant dense<0.000000e+00> : vector<64x256xf32>
    %7 = tpu.matmul %6, %5, %cst_6 {dimension_numbers = #tpu.dot_dimension_numbers<[1], [0], [0], [1], [0, 0, 1, 1], [], []>} : vector<64x64xbf16>, vector<64x256xbf16>, vector<64x256xf32> -> vector<64x256xf32>
    %c0_7 = arith.constant 0 : index
    %c0_8 = arith.constant 0 : index
    %8 = vector.load %arg4[%c0_7, %c0_8] : memref<64x21xbf16, #tpu.memory_space<vmem>>, vector<64x21xbf16>
    %cst_9 = arith.constant dense<0.000000e+00> : vector<64x256xf32>
    %9 = tpu.matmul %8, %0, %cst_9 {dimension_numbers = #tpu.dot_dimension_numbers<[1], [0], [0], [1], [0, 0, 1, 1], [], []>} : vector<64x21xbf16>, vector<21x256xbf16>, vector<64x256xf32> -> vector<64x256xf32>
    %10 = arith.addf %7, %9 : vector<64x256xf32>
    %cst_10 = arith.constant 0.000000e+00 : f32
    %11 = vector.broadcast %cst_10 : f32 to vector<64x256xf32>
    %12 = arith.maximumf %10, %11 : vector<64x256xf32>
    %c0_11 = arith.constant 0 : index
    %c0_12 = arith.constant 0 : index
    %13 = vector.load %arg5[%c0_11, %c0_12] : memref<64x1xf32, #tpu.memory_space<vmem>>, vector<64x1xf32>
    %14 = vector.broadcast %13 : vector<64x1xf32> to vector<64x256xf32>
    %15 = arith.mulf %12, %14 : vector<64x256xf32>
    %cst_13 = arith.constant dense<0.000000e+00> : vector<256xf32>
    %16 = vector.multi_reduction <add>, %15, %cst_13 [0] : vector<64x256xf32> to vector<256xf32>
    %17 = vector.shape_cast %16 : vector<256xf32> to vector<1x256xf32>
    %c0_14 = arith.constant 0 : index
    %c0_15 = arith.constant 0 : index
    %18 = vector.load %arg6[%c0_14, %c0_15] : memref<1x1xf32, #tpu.memory_space<vmem>>, vector<1x1xf32>
    %19 = vector.broadcast %18 : vector<1x1xf32> to vector<1x256xf32>
    %20 = arith.addf %17, %19 : vector<1x256xf32>
    %c0_16 = arith.constant 0 : index
    %c0_17 = arith.constant 0 : index
    %c0_18 = arith.constant 0 : index
    %21 = vector.load %arg7[%c0_16, %c0_17, %c0_18] : memref<1x1x256xf32, #tpu.memory_space<vmem>>, vector<1x1x256xf32>
    %22 = vector.shape_cast %21 : vector<1x1x256xf32> to vector<1x256xf32>
    %23 = vector.shape_cast %20 : vector<1x256xf32> to vector<1x1x256xf32>
    tpu.vector_store %arg7[%c0_16, %c0_17, %c0_18], %23 {strides = array<i32>} : memref<1x1x256xf32, #tpu.memory_space<vmem>>, vector<1x1x256xf32>,
    return
  }
  func.func @transform_0(%arg0: i32) -> (i32, i32) {
    %c0_i32 = arith.constant 0 : i32
    %c0_i32_0 = arith.constant 0 : i32
    return %c0_i32, %arg0 : i32, i32
  }
  func.func @transform_1(%arg0: i32) -> (i32, i32) {
    %c0_i32 = arith.constant 0 : i32
    %c0_i32_0 = arith.constant 0 : i32
    %c0_i32_1 = arith.constant 0 : i32
    return %c0_i32, %c0_i32_0 : i32, i32
  }
  func.func @transform_2(%arg0: i32) -> (i32, i32) {
    %c0_i32 = arith.constant 0 : i32
    %c0_i32_0 = arith.constant 0 : i32
    %c0_i32_1 = arith.constant 0 : i32
    return %c0_i32, %c0_i32_0 : i32, i32
  }
  func.func @transform_3(%arg0: i32) -> (i32, i32) {
    %c0_i32 = arith.constant 0 : i32
    %c0_i32_0 = arith.constant 0 : i32
    %c0_i32_1 = arith.constant 0 : i32
    return %c0_i32, %c0_i32_0 : i32, i32
  }
  func.func @transform_4(%arg0: i32) -> (i32, i32) {
    %c0_i32 = arith.constant 0 : i32
    %c0_i32_0 = arith.constant 0 : i32
    %c0_i32_1 = arith.constant 0 : i32
    return %c0_i32, %c0_i32_0 : i32, i32
  }
  func.func @transform_5(%arg0: i32) -> (i32, i32) {
    %c0_i32 = arith.constant 0 : i32
    %c0_i32_0 = arith.constant 0 : i32
    %c0_i32_1 = arith.constant 0 : i32
    return %c0_i32, %c0_i32_0 : i32, i32
  }
  func.func @transform_6(%arg0: i32) -> (i32, i32, i32) {
    %c0_i32 = arith.constant 0 : i32
    %c0_i32_0 = arith.constant 0 : i32
    %c0_i32_1 = arith.constant 0 : i32
    return %arg0, %c0_i32, %c0_i32_0 : i32, i32, i32
  }
}

</mosaic_0001>

<bundles_post_ra>
// kernel: critic_forward.1
= control target key start
LH: loop header
LB: loop body
LE: loop exit
PB: predicated region body
PF: predicated region fallthrough
CT: control target
= control target key end

     0   :  { %s1198_s0 = inlined_call_operand.vmem [shape: bf16[21,512], index: 0, kind: input, shape index: {}]   ;;  %s1199_s1 = inlined_call_operand.vmem [shape: bf16[64,21], index: 1, kind: input, shape index: {}]   ;;  %s1200_s2 = inlined_call_operand.vmem [shape: bf16[64,64], index: 2, kind: input, shape index: {}]   ;;  %s1201_s3 = inlined_call_operand.vmem [shape: bf16[64,21], index: 3, kind: input, shape index: {}]   ;;  %s1202_s4 = inlined_call_operand.vmem [shape: f32[64,1], index: 4, kind: input, shape index: {}]   ;;  %s1203_s5 = inlined_call_operand.<no memory space> [shape: f32[1,1], index: 5, kind: input, shape index: {}]   ;;  %s1204_s6 = inlined_call_operand.vmem [shape: f32[2,1,256], index: 6, kind: output, shape index: {}]  }
   0x1   :  { %v11_v0 = vstv %s1203_s5 }
   0x2   :  { %12 = vst [vmem:[#allocation2] sm:$0x1] %v11_v0 }
   0x3   :  { %s1062_s23 = smov 0   ;;  %s1064_s24 = smov 0  }
   0x4   :  { %s1066_s25 = smov 0  }
   0x5 LB: > { %s890_s5 = sadd.s32 4294967295, %s1019_s25   ;;  %s1079_s26 = sadd.s32 1, %s1019_s25   ;;  %s1019_s25 = sphi %s1066_s25, %s1207_s25   ;;  %s1015_s24 = sphi %s1064_s24, %s1206_s24   ;;  %s1011_s23 = sphi %s1062_s23, %s1205_s23  }
   0x6   : > { %s22_s27 = ssub.s32 %s1019_s25, %s1079_s26  ;;  %s25_s28 = sadd.s32 1, %s1015_s24 }
   0x7   : > { %p23_p0 = scmp.eq.s32.totalorder %s22_s27, 0  ;;  %p32_p1 = scmp.ne.s32.totalorder %s1015_s24, %s1011_s23 }
   0x8   : > { %p33_p2 = scmp.eq.s32.totalorder %s1019_s25, 0  ;;  %p893_p4 = scmp.ge.s32.totalorder %s1019_s25, 2 }
   0x9   : > { %s1088_s29 = scalar_select %p23_p0, %s1015_s24, %s25_s28  }
   0xa   : > { %p34_p3 = por %p33_p2, %p32_p1  ;;  %204 = sbr.rel (%p893_p4) target bundleno = 24 (0x18), region = 36 }
  0x11   : > { %207 = sbr.rel (!%p34_p3) target bundleno = 24 (0x18), region = 40  ;;  %s209_s30 = sand.u32 (%p34_p3), 1, %s1015_s24  }
  0x12   : > { %s928_s7 = sshll.u32 (%p34_p3), %s1019_s25, 3  ;;  %s949_s8 = smul.u32 (%p34_p3), 24, %s209_s30 }
  0x13   : > { %s214_s11 = scalar_lea.vmem (%p34_p3), %s1198_s0, %s928_s7 }
  0x14   : > { %v246_v1 = vld [vmem:[%s214_s11] sm:$0xff] (%p34_p3)  ;;  %v248_v2 = vld [vmem:[%s214_s11 + $0x10] sm:$0xff] (%p34_p3)  ;;  %s211_s12 = scalar_lea.vmem (%p34_p3), [#allocation3], %s949_s8 }
  0x15   : > { %v250_v3 = vld [vmem:[%s214_s11 + $0x20] sm:$0xff] (%p34_p3)  ;;  %247 = vst [vmem:[%s211_s12] sm:$0xff] (%p34_p3), %v246_v1  ;;  %249 = vst [vmem:[%s211_s12 + $0x8] sm:$0xff] (%p34_p3), %v248_v2 }
  0x16   : > { %251 = vst [vmem:[%s211_s12 + $0x10] sm:$0xff] (%p34_p3), %v250_v3 }
  0x18 PF: > { %p896_p5 = scmp.ge.s32.totalorder %s1019_s25, 1  ;;  %p256_p6 = scmp.lt.s32.totalorder %s1019_s25, 3 }
  0x1a   : > { %p257_p7 = pnand %p896_p5, %p256_p6 }
  0x1b   : > { %s263_s13 = sand.u32 (!%p257_p7), 1, %s1011_s23   ;;  %vm356_vm0 = vcmask (!%p257_p7), 1041408   ;;  %v1021_v4 = vmov (!%p257_p7), 0   ;;  %vm357_vm1 = vcmask (!%p257_p7), 1042432   ;;  %v1022_v5 = vmov (!%p257_p7), 65535   ;;  %v985_v15 = vld [vmem:[%s1199_s1] sm:$0xff] (!%p257_p7)  }
  0x1c   : > { %260 = sbr.rel (%p257_p7) target bundleno = 554 (0x22a), region = 78  ;;  %398 = vmatprep.mubr.bf16.mxu0 (!%p257_p7), %v1021_v4  ;;  %563 = vmatprep.mubr.bf16.mxu1 (!%p257_p7), %v1021_v4  ;;  %v358_v6 = vsel (!%p257_p7), %vm356_vm0, 4294967295, %v1022_v5  ;;  %vm343_vm2 = vcmask (!%p257_p7), 171008   ;;  %v986_v16 = vld [vmem:[%s1199_s1 + $0x8] sm:$0xff] (!%p257_p7)   ;;  %v987_v17 = vld [vmem:[%s1199_s1 + $0x10] sm:$0xff] (!%p257_p7)   ;;  %v988_v18 = vld [vmem:[%s1199_s1 + $0x18] sm:$0xff] (!%p257_p7)  }
  0x1d   : > { %s950_s14 = smul.u32 (!%p257_p7), 24, %s263_s13  ;;  %978 = vset.pattern.permute.xlu0 (!%p257_p7), %v1021_v4  ;;  %979 = vset.pattern.permute.xlu1 (!%p257_p7), %v1021_v4  ;;  %v359_v10 = vsel (!%p257_p7), %vm357_vm1, %v358_v6, 0  ;;  %v989_v19 = vld [vmem:[%s1201_s3 + $0x10] sm:$0xff] (!%p257_p7)   ;;  %v990_v20 = vld [vmem:[%s1201_s3 + $0x18] sm:$0xff] (!%p257_p7)   ;;  %v991_v21 = vld [vmem:[%s1201_s3] sm:$0xff] (!%p257_p7)   ;;  %vm604_vm3 = vcmask (!%p257_p7), 523264  }
  0x1e   : > { %v993_v22 = vld [vmem:[%s1201_s3 + $0x8] sm:$0xff] (!%p257_p7)   ;;  %v706_v23 = vld [vmem:[%s1202_s4] sm:$0xff] (!%p257_p7)  ;;  %v708_v24 = vld [vmem:[%s1202_s4 + $0x10] sm:$0xff] (!%p257_p7)  ;;  %p292_p8 = scmp.lt.s32.totalorder (!%p257_p7), %s890_s5, 1 }
  0x1f   : > { %s265_s15 = scalar_lea.vmem (!%p257_p7), [#allocation3], %s950_s14  ;;  %716 = vperm.xlu0 (!%p257_p7), %978, %v706_v23   ;;  %726 = vperm.xlu1 (!%p257_p7), %979, %v708_v24   ;;  %v707_v25 = vld [vmem:[%s1202_s4 + $0x8] sm:$0xff] (!%p257_p7)  ;;  %v709_v26 = vld [vmem:[%s1202_s4 + $0x18] sm:$0xff] (!%p257_p7)  ;;  %v710_v27 = vld [vmem:[%s1202_s4 + $0x20] sm:$0xff] (!%p257_p7) }
  0x20   : > { %v980_v7 = vld [vmem:[%s265_s15 + $0x4] ss:$8 sps:$4 sm:$0xff] (!%p257_p7)   ;;  %v982_v8 = vld [vmem:[%s265_s15] ss:$8 sps:$4 sm:$0xff] (!%p257_p7)   ;;  %v299_v9 = vld [vmem:[%s265_s15 + $0x10] sm:$0x77] (!%p257_p7) }
  0x21   : > { %366 = vmatprep.subr.bf16.mxu0 (!%p257_p7), %v980_v7  ;;  %v905_v11 = vcombine.high (!%p257_p7), %v299_v9, %v299_v9  ;;  %v904_v12 = vcombine.low (!%p257_p7), %v299_v9, %v299_v9  ;;  %929 = vmatprep.subr.bf16.mxu1 (!%p257_p7), %v980_v7  ;;  %v711_v28 = vld [vmem:[%s1202_s4 + $0x28] sm:$0xff] (!%p257_p7)  ;;  %v712_v29 = vld [vmem:[%s1202_s4 + $0x30] sm:$0xff] (!%p257_p7)  ;;  %v713_v30 = vld [vmem:[%s1202_s4 + $0x38] sm:$0xff] (!%p257_p7) }
  0x22   : > { %367 = vmatpush1.bf16.msra.mxu0 (!%p257_p7), %v982_v8  ;;  %931 = vmatpush1.bf16.msra.mxu1 (!%p257_p7), %v982_v8  ;;  %v796_v31 = vld [vmem:[#allocation2] sm:$0x1] (!%p257_p7) }
  0x23   : > { %v364_v13 = vand.u32 %v905_v11, %v359_v10  ;;  %v361_v14 = vand.u32 %v904_v12, %v359_v10  ;;  %721 = vperm.xlu0 %978, %v707_v25   ;;  %731 = vperm.xlu1 %979, %v709_v26   ;;  %v992_v9 = vld [vmem:[%s1200_s2] sm:$0xff]   ;;  %v994_v10 = vld [vmem:[%s1200_s2 + $0x8] sm:$0xff]   ;;  %v995_v11 = vld [vmem:[%s1200_s2 + $0x10] sm:$0xff]   ;;  %s1209_s5 = smov (!%p292_p8, %s890_s5), 1 }
  0x24   : > { %v996_v12 = vld [vmem:[%s1200_s2 + $0x18] sm:$0xff]   ;;  %s897_s16 = sshll.u32 %s1209_s5, 1 }
  0x25   : > { %368 = vmatprep.subr.bf16.mxu0 %v364_v13  ;;  %930 = vmatprep.subr.bf16.mxu1 %v364_v13  ;;  %s295_s19 = scalar_lea.vmem %s1204_s6, %s897_s16 }
  0x26   : > { %369 = vmatpush1.bf16.msra.mxu0 %v361_v14  ;;  %932 = vmatpush1.bf16.msra.mxu1 %v361_v14 }
  0x27   : > { %511 = vmatprep.subr.bf16.mxu0 %v980_v7  ;;  %736 = vperm.xlu0 %978, %v710_v27  }
  0x28   : > { %741 = vperm.xlu1 %979, %v711_v28  }
  0x29   : > { %906 = vmatmul.mubr.msk.bf16.vlgmr.msra.gmra.mrb[0].mxu0 %vm343_vm2, %v985_v15  ;;  %916 = vmatmul.mubr.msk.bf16.vlgmr.msra.gmra.mrb[0].mxu1 %vm343_vm2, %v989_v19 }
  0x2a   : > { %408 = vmatprep.mubr.bf16.mxu0 %v1021_v4  ;;  %512 = vmatpush1.bf16.msra.mxu0 %v982_v8 }
  0x2b   : > { %513 = vmatprep.subr.bf16.mxu0 %v364_v13  ;;  %573 = vmatprep.mubr.bf16.mxu1 %v1021_v4 }
  0x2c   : > { %746 = vperm.xlu0 %978, %v712_v29   ;;  %751 = vperm.xlu1 %979, %v713_v30  }
  0x2e   : > { %514 = vmatpush1.bf16.msra.mxu0 %v361_v14 }
  0x30   : > { %799 = vperm.xlu0 %978, %v796_v31  }
  0x31   : > { %907 = vmatmul.mubr.msk.bf16.gmra.mrb[4].mxu0 %vm343_vm2, %v986_v16  ;;  %917 = vmatmul.mubr.msk.bf16.gmra.mrb[4].mxu1 %vm343_vm2, %v990_v20 }
  0x32   : > { %418 = vmatprep.mubr.bf16.mxu0 %v1021_v4  ;;  %649 = vmatprep.mubr.bf16.mxu1 %v1021_v4 }
  0x39   : > { %908 = vmatmul.mubr.msk.bf16.gmra.mrb[8].mxu0 %vm343_vm2, %v987_v17 }
  0x3a   : > { %428 = vmatprep.mubr.bf16.mxu0 %v1021_v4 }
  0x41   : > { %909 = vmatmul.mubr.msk.bf16.gmra.mrb[12].mxu0 %vm343_vm2, %v988_v18 }
  0x42   : > { %543 = vmatprep.mubr.bf16.mxu0 %v1021_v4 }
  0x49   : > { %914 = vmatmul.mubr.msk.bf16.vlgmr.msra.gmra.mrb[16].mxu0 %vm343_vm2, %v991_v21 }
  0x4a   : > { %553 = vmatprep.mubr.bf16.mxu0 %v1021_v4 }
  0x51   : > { %915 = vmatmul.mubr.msk.bf16.gmra.mrb[20].mxu0 %vm343_vm2, %v993_v22 }
  0x9e   : > { %v717_v21 = vpop.permute.xlu0 %716 }
  0xfc   : > { %v400_v32 = vpop.f32.mrb[0].mxu0 }
  0xfd   : > { %v402_v33 = vpop.f32.mrb[1].mxu0  ;;  %v439_v35 = vmax.f32 %v400_v32, 0.0  ;;  %v722_v32 = vpop.permute.xlu0 %721 }
  0xfe   : > { %v404_v34 = vpop.f32.mrb[2].mxu0  ;;  %v440_v38 = vmax.f32 %v402_v33, 0.0 }
  0xff   : > { %v441_v36 = vmax.f32 %v404_v34, 0.0  ;;  %v406_v37 = vpop.f32.mrb[3].mxu0 }
 0x100   : > { %v442_v39 = vmax.f32 %v406_v37, 0.0 }
 0x101   : > { %v455_v40 = vpack.c.bf16 %v441_v36, %v439_v35 }
 0x102   : > { %v456_v41 = vpack.c.bf16 %v442_v39, %v440_v38  ;;  %v727_v38 = vpop.permute.xlu1 %726 }
 0x104   : > { %v410_v42 = vpop.f32.mrb[4].mxu0  ;;  %617 = vmatprep.subr.bf16.mxu1 %v456_v41 }
 0x105   : > { %v412_v43 = vpop.f32.mrb[5].mxu0  ;;  %618 = vmatpush1.bf16.msra.mxu1 %v455_v40  ;;  %v443_v45 = vmax.f32 %v410_v42, 0.0 }
 0x106   : > { %v414_v44 = vpop.f32.mrb[6].mxu0  ;;  %v444_v48 = vmax.f32 %v412_v43, 0.0 }
 0x107   : > { %v445_v46 = vmax.f32 %v414_v44, 0.0  ;;  %v416_v47 = vpop.f32.mrb[7].mxu0 }
 0x108   : > { %v446_v49 = vmax.f32 %v416_v47, 0.0 }
 0x109   : > { %v457_v50 = vpack.c.bf16 %v445_v46, %v443_v45 }
 0x10a   : > { %v458_v51 = vpack.c.bf16 %v446_v49, %v444_v48 }
 0x10c   : > { %v420_v52 = vpop.f32.mrb[8].mxu0  ;;  %619 = vmatprep.subr.bf16.mxu1 %v458_v51 }
 0x10d   : > { %v422_v53 = vpop.f32.mrb[9].mxu0  ;;  %620 = vmatpush1.bf16.msra.mxu1 %v457_v50  ;;  %v447_v55 = vmax.f32 %v420_v52, 0.0 }
 0x10e   : > { %v424_v54 = vpop.f32.mrb[10].mxu0  ;;  %v448_v58 = vmax.f32 %v422_v53, 0.0 }
 0x10f   : > { %v449_v56 = vmax.f32 %v424_v54, 0.0  ;;  %v426_v57 = vpop.f32.mrb[11].mxu0  ;;  %v732_v54 = vpop.permute.xlu1 %731 }
 0x110   : > { %v450_v59 = vmax.f32 %v426_v57, 0.0 }
 0x111   : > { %v459_v60 = vpack.c.bf16 %v449_v56, %v447_v55 }
 0x112   : > { %v460_v61 = vpack.c.bf16 %v450_v59, %v448_v58 }
 0x114   : > { %v430_v62 = vpop.f32.mrb[12].mxu0  ;;  %621 = vmatprep.subr.bf16.mxu1 %v460_v61 }
 0x115   : > { %v432_v63 = vpop.f32.mrb[13].mxu0  ;;  %622 = vmatpush1.bf16.msra.mxu1 %v459_v60  ;;  %v451_v1 = vmax.f32 %v430_v62, 0.0 }
 0x116   : > { %v434_v0 = vpop.f32.mrb[14].mxu0  ;;  %v452_v5 = vmax.f32 %v432_v63, 0.0 }
 0x117   : > { %v453_v2 = vmax.f32 %v434_v0, 0.0  ;;  %v436_v3 = vpop.f32.mrb[15].mxu0  ;;  %v737_v0 = vpop.permute.xlu0 %736 }
 0x118   : > { %v454_v6 = vmax.f32 %v436_v3, 0.0 }
 0x119   : > { %v461_v7 = vpack.c.bf16 %v453_v2, %v451_v1 }
 0x11a   : > { %v462_v8 = vpack.c.bf16 %v454_v6, %v452_v5 }
 0x11c   : > { %623 = vmatprep.subr.bf16.mxu1 %v462_v8  ;;  %v545_v13 = vpop.f32.mrb[16].mxu0  ;;  %v742_v8 = vpop.permute.xlu1 %741 }
 0x11d   : > { %624 = vmatpush1.bf16.msra.mxu1 %v461_v7  ;;  %v547_v14 = vpop.f32.mrb[17].mxu0 }
 0x11e   : > { %v549_v15 = vpop.f32.mrb[18].mxu0 }
 0x11f   : > { %v551_v16 = vpop.f32.mrb[19].mxu0 }
 0x120   : > { %922 = vmatmul.mubr.msk.bf16.vlgmr.msra.gmra.mrb[8].mxu1 %vm604_vm3, %v992_v9 }
 0x121   : > { %659 = vmatprep.mubr.bf16.mxu1 %v1021_v4 }
 0x124   : > { %v555_v17 = vpop.f32.mrb[20].mxu0 }
 0x125   : > { %v557_v18 = vpop.f32.mrb[21].mxu0 }
 0x126   : > { %v559_v19 = vpop.f32.mrb[22].mxu0 }
 0x127   : > { %v561_v20 = vpop.f32.mrb[23].mxu0 }
 0x128   : > { %923 = vmatmul.mubr.msk.bf16.gmra.mrb[12].mxu1 %vm604_vm3, %v994_v10 }
 0x129   : > { %669 = vmatprep.mubr.bf16.mxu1 %v1021_v4 }
 0x130   : > { %924 = vmatmul.mubr.msk.bf16.gmra.mrb[0].mxu1 %vm604_vm3, %v995_v11 }
 0x131   : > { %679 = vmatprep.mubr.bf16.mxu1 %v1021_v4 }
 0x138   : > { %925 = vmatmul.mubr.msk.bf16.gmra.mrb[4].mxu1 %vm604_vm3, %v996_v12 }
 0x1f3   : > { %v651_v22 = vpop.f32.mrb[8].mxu1 }
 0x1f4   : > { %v652_v23 = vadd.f32 %v651_v22, %v545_v13  ;;  %v653_v24 = vpop.f32.mrb[9].mxu1 }
 0x1f5   : > { %v654_v25 = vadd.f32 %v653_v24, %v547_v14  ;;  %v655_v26 = vpop.f32.mrb[10].mxu1 }
 0x1f6   : > { %v690_v4 = vmax.f32 %v652_v23, 0.0  ;;  %v656_v27 = vadd.f32 %v655_v26, %v549_v15  ;;  %v657_v28 = vpop.f32.mrb[11].mxu1  ;;  %v752_v26 = vpop.permute.xlu1 %751 }
 0x1f7   : > { %v691_v29 = vmax.f32 %v654_v25, 0.0  ;;  %v658_v30 = vadd.f32 %v657_v28, %v551_v16 }
 0x1f8   : > { %v692_v31 = vmax.f32 %v656_v27, 0.0  ;;  %v754_v34 = vmul.f32 %v717_v21, %v690_v4 }
 0x1f9   : > { %v693_v33 = vmax.f32 %v658_v30, 0.0  ;;  %v755_v36 = vmul.f32 %v717_v21, %v691_v29 }
 0x1fa   : > { %v756_v35 = vmul.f32 %v722_v32, %v692_v31 }
 0x1fb   : > { %v757_v37 = vmul.f32 %v722_v32, %v693_v33  ;;  %v661_v39 = vpop.f32.mrb[12].mxu1  ;;  %v802_v32 = vlaneseq }
 0x1fc   : > { %v770_v40 = vadd.f32 %v756_v35, %v754_v34  ;;  %v662_v41 = vadd.f32 %v661_v39, %v555_v17  ;;  %v663_v42 = vpop.f32.mrb[13].mxu1 }
 0x1fd   : > { %v783_v43 = vadd.f32 %v757_v37, %v755_v36  ;;  %v664_v44 = vadd.f32 %v663_v42, %v557_v18  ;;  %v665_v45 = vpop.f32.mrb[14].mxu1  ;;  %v803_v37 = vshrl.u32 %v802_v32, 7  ;;  %vm828_vm4 = vcmp.lt.s32.totalorder %v802_v32, 256 }
 0x1fe   : > { %v694_v46 = vmax.f32 %v662_v41, 0.0  ;;  %v666_v47 = vadd.f32 %v665_v45, %v559_v19  ;;  %v667_v48 = vpop.f32.mrb[15].mxu1  ;;  %v1023_v41 = vmov 1966171168  }
 0x1ff   : > { %v695_v49 = vmax.f32 %v664_v44, 0.0  ;;  %v668_v50 = vadd.f32 %v667_v48, %v561_v20  ;;  %v747_v20 = vpop.permute.xlu0 %746  ;;  %v812_v42 = vunpack.c.l.s4 %v1023_v41  ;;  %v804_v44 = vsub.s32 0, %v803_v37 }
 0x200   : > { %v758_v51 = vmul.f32 %v727_v38, %v694_v46  ;;  %v696_v52 = vmax.f32 %v666_v47, 0.0 }
 0x201   : > { %v759_v53 = vmul.f32 %v727_v38, %v695_v49  ;;  %v697_v55 = vmax.f32 %v668_v50, 0.0  ;;  %v813_v49 = vunpack.c.0.s8 %v812_v42 }
 0x202   : > { %v771_v56 = vadd.f32 %v770_v40, %v758_v51  ;;  %v760_v57 = vmul.f32 %v732_v54, %v696_v52 }
 0x203   : > { %v784_v58 = vadd.f32 %v783_v43, %v759_v53  ;;  %v761_v59 = vmul.f32 %v732_v54, %v697_v55  ;;  %v671_v60 = vpop.f32.mrb[0].mxu1  ;;  %v800_v46 = vpop.permute.xlu0 %799  ;;  %v816_v55 = vsub.s32 %v813_v49, %v803_v37 }
 0x204   : > { %v772_v61 = vadd.f32 %v771_v56, %v760_v57  ;;  %v698_v62 = vmax.f32 %v671_v60, 0.0  ;;  %v673_v63 = vpop.f32.mrb[1].mxu1  ;;  %v805_v51 = vrot.slane %v800_v46, %v804_v44 }
 0x205   : > { %v785_v1 = vadd.f32 %v784_v58, %v761_v59  ;;  %v699_v2 = vmax.f32 %v673_v63, 0.0  ;;  %v675_v3 = vpop.f32.mrb[2].mxu1 }
 0x206   : > { %v762_v5 = vmul.f32 %v737_v0, %v698_v62  ;;  %v700_v6 = vmax.f32 %v675_v3, 0.0  ;;  %v677_v7 = vpop.f32.mrb[3].mxu1 }
 0x207   : > { %v763_v9 = vmul.f32 %v737_v0, %v699_v2  ;;  %v701_v10 = vmax.f32 %v677_v7, 0.0 }
 0x208   : > { %v773_v11 = vadd.f32 %v772_v61, %v762_v5  ;;  %v764_v12 = vmul.f32 %v742_v8, %v700_v6 }
 0x209   : > { %v786_v13 = vadd.f32 %v785_v1, %v763_v9  ;;  %v765_v14 = vmul.f32 %v742_v8, %v701_v10 }
 0x20a   : > { %v774_v15 = vadd.f32 %v773_v11, %v764_v12 }
 0x20b   : > { %v787_v16 = vadd.f32 %v786_v13, %v765_v14  ;;  %v681_v17 = vpop.f32.mrb[4].mxu1 }
 0x20c   : > { %v702_v18 = vmax.f32 %v681_v17, 0.0  ;;  %v683_v19 = vpop.f32.mrb[5].mxu1 }
 0x20d   : > { %v703_v21 = vmax.f32 %v683_v19, 0.0  ;;  %v685_v22 = vpop.f32.mrb[6].mxu1 }
 0x20e   : > { %v766_v23 = vmul.f32 %v747_v20, %v702_v18  ;;  %v704_v24 = vmax.f32 %v685_v22, 0.0  ;;  %v687_v25 = vpop.f32.mrb[7].mxu1 }
 0x20f   : > { %v767_v4 = vmul.f32 %v747_v20, %v703_v21  ;;  %v705_v27 = vmax.f32 %v687_v25, 0.0 }
 0x210   : > { %v775_v28 = vadd.f32 %v774_v15, %v766_v23  ;;  %v768_v29 = vmul.f32 %v752_v26, %v704_v24 }
 0x211   : > { %v788_v30 = vadd.f32 %v787_v16, %v767_v4  ;;  %v769_v31 = vmul.f32 %v752_v26, %v705_v27 }
 0x212   : > { %v776_v33 = vadd.f32 %v775_v28, %v768_v29 }
 0x213   : > { %v789_v34 = vadd.f32 %v788_v30, %v769_v31 }
 0x214   : > { %v777_v35 = vrot.slane %v776_v33, 4 }
 0x215   : > { %v790_v36 = vrot.slane %v789_v34, 4 }
 0x216   : > { %v778_v38 = vadd.f32 %v777_v35, %v776_v33 }
 0x217   : > { %v791_v39 = vadd.f32 %v790_v36, %v789_v34 }
 0x218   : > { %v779_v40 = vrot.slane %v778_v38, 2 }
 0x219   : > { %v792_v43 = vrot.slane %v791_v39, 2 }
 0x21a   : > { %v780_v45 = vadd.f32 %v779_v40, %v778_v38 }
 0x21b   : > { %v793_v47 = vadd.f32 %v792_v43, %v791_v39 }
 0x21c   : > { %v781_v48 = vrot.slane %v780_v45, 1 }
 0x21d   : > { %v794_v50 = vrot.slane %v793_v47, 1 }
 0x21e   : > { %v782_v52 = vadd.f32 %v781_v48, %v780_v45 }
 0x21f   : > { %v795_v53 = vadd.f32 %v794_v50, %v793_v47 }
 0x220   : > { %v806_v54 = vadd.f32 %v805_v51, %v782_v52 }
 0x221   : > { %v807_v56 = vadd.f32 %v805_v51, %v795_v53 }
 0x223   : > { %v810_v57 = vcombine.low %v806_v54, %v807_v56 }
 0x225   : > { %v817_v58 = vrot.slane %v810_v57, %v816_v55 }
 0x227   : > { %v824_v59 = vrot.slane %v817_v58, %v816_v55 }
 0x229   : > { %830 = vst.msk [vmem:[%s295_s19] sm:$0x3] %vm828_vm4, %v824_v59 }
 0x22a PF: > { %p15_p9 = scmp.ge.s32.totalorder %s1079_s26, 4   ;;  %s1205_s23 = smov %s1015_s24 }
 0x22b   : > { %s1206_s24 = smov %s1088_s29  ;;  %s1207_s25 = smov %s1079_s26 }
 0x22c   :  { %17 = sbr.rel (!%p15_p9) target bundleno = 5 (0x5), region = 117 }

</bundles_post_ra>
